<compile_context>
chip_gen: v5e
topology: v5e:2x2
jax: 0.10.0
libtpu: 0.0.40
codegen_flags: <defaults>
</compile_context>

<pallas_src>
import jax
import jax.numpy as jnp
from jax.experimental import pallas as pl
from jax.experimental.pallas import tpu as pltpu

# ----- small, module-consistent hyperparameters -----
B, S, D, H, DFF = 2, 8, 32, 4, 64
DK = D // H
BS = B * S
EPS = 1e-6
NEG_INF = -1e9


def encoder_block_kernel(x_ref, bias_ref, wbig_ref, w1_ref, w2_ref,
                         b1_ref, vec_ref, o_ref):
    # Shape-generic body: R == BS for the collapsed call, R == S for the
    # per-batch (v7x, grid over batch) call.
    R = x_ref.shape[0]
    x = x_ref[...]                       # (R, D)
    bias = bias_ref[0]                   # (H*R, H*R) precomputed additive bias

    g1 = vec_ref[0:1, :]                 # LN1 gamma
    be1 = vec_ref[1:2, :]                # LN1 beta
    g2 = vec_ref[2:3, :]                 # LN2 gamma
    be2 = vec_ref[3:4, :]                # LN2 beta
    b2 = vec_ref[4:5, :]                 # FFN second bias

    def layer_norm(z, gamma, beta):
        mu = jnp.mean(z, axis=-1, keepdims=True)
        zc = z - mu
        var = jnp.mean(zc * zc, axis=-1, keepdims=True)
        return zc * jax.lax.rsqrt(var + EPS) * gamma + beta

    # ---------- sublayer 1: pre-LN multi-head self-attention + residual ----------
    xn = layer_norm(x, g1, be1)                                        # (R, D)

    # Single fused projection.  Columns of W_big (host-packed):
    #   [0      , D      ) : Wq per head, pre-scaled by 1/sqrt(dk)
    #   [D      , 2D     ) : Wk per head
    #   [2D     , 2D+H*D ) : per-head (Wv_h @ Wo_h)  -> values already output-projected
    proj = jnp.dot(xn, wbig_ref[...], preferred_element_type=jnp.float32)  # (R, 2D+H*D)

    # Head-flattened rows: row index = h*R + i.
    q = jnp.concatenate(
        [proj[:, h * DK:(h + 1) * DK] for h in range(H)], axis=0)          # (H*R, DK)
    k = jnp.concatenate(
        [proj[:, D + h * DK:D + (h + 1) * DK] for h in range(H)], axis=0)  # (H*R, DK)
    vo_off = 2 * D
    vw = jnp.concatenate(
        [proj[:, vo_off + h * D: vo_off + (h + 1) * D] for h in range(H)],
        axis=0)                                                            # (H*R, D)

    # One matmul for all heads' scores; bias makes off-head/off-batch/masked
    # columns -1e9 so they vanish exactly after the softmax.
    scores = jax.lax.dot_general(q, k, (((1,), (1,)), ((), ())),
                                 preferred_element_type=jnp.float32)       # (H*R, H*R)
    scores = scores + bias
    smax = jnp.max(scores, axis=-1, keepdims=True)
    p = jnp.exp(scores - smax)
    denom = jnp.sum(p, axis=-1, keepdims=True)                             # (H*R, 1)

    # One matmul for PV (values already carry Wo); exact normalization after.
    pvw = jnp.dot(p, vw, preferred_element_type=jnp.float32)               # (H*R, D)
    pvw = pvw * (1.0 / denom)

    # Merge heads: sum of the H row blocks (tiny VPU adds).
    attn = pvw[0:R, :]
    for h in range(1, H):
        attn = attn + pvw[h * R:(h + 1) * R, :]
    x1 = x + attn                        # dropout == identity (eval)

    # ---------- sublayer 2: pre-LN feed-forward + residual ----------
    xn2 = layer_norm(x1, g2, be2)
    hid = jnp.dot(xn2, w1_ref[...], preferred_element_type=jnp.float32) + b1_ref[...]
    hid = jnp.maximum(hid, 0.0)          # ReLU (dropout == identity)
    ff = jnp.dot(hid, w2_ref[...], preferred_element_type=jnp.float32) + b2
    o_ref[...] = x1 + ff


def prepare_params(params):
    """One-time, host-side parameter transform (NOT part of the per-call path)."""
    (wq, wk, wv, wo, w1, b1, w2, b2, g1, be1, g2, be2) = params
    scale = 1.0 / (DK ** 0.5)
    # Fold the output projection into the value projection per head:
    #   (xn @ Wv_h) @ Wo_h == xn @ (Wv_h @ Wo_h)
    wvo = jnp.concatenate(
        [wv[:, h * DK:(h + 1) * DK] @ wo[h * DK:(h + 1) * DK, :] for h in range(H)],
        axis=1)                                                   # (D, H*D)
    w_big = jnp.concatenate([wq * scale, wk, wvo], axis=1)        # (D, 2D + H*D)
    vec_pack = jnp.concatenate([g1, be1, g2, be2, b2], axis=0)    # (5, D)
    return (w_big, w1, w2, b1, vec_pack)


def build_attention_bias(src_mask, grid_b):
    """Additive bias (grid_b, H*R, H*R), R = B*S // grid_b, rows/cols = h*R + i.

    0 where (same head) AND (same batch, only relevant when grid_b == 1) AND
    (key position unmasked); -1e9 elsewhere.  Computed outside the kernel.
    """
    R = BS // grid_b
    key_ok = (src_mask.reshape(B, S) != 0)                        # (B, S)
    if grid_b == 1:
        kf = key_ok.reshape(1, BS)                                # (1, BS)
        rb = jnp.arange(BS, dtype=jnp.int32) // S
        ok = (rb[:, None] == rb[None, :])[None, :, :] & kf[:, None, :]   # (1, BS, BS)
    else:
        ok = jnp.broadcast_to(key_ok[:, None, :], (B, S, S))      # (B, S, S)
    eye_h = jnp.eye(H, dtype=bool)
    ok_h = eye_h[None, :, :, None, None] & ok[:, None, None, :, :]        # (G,H,H,R,R)
    ok_h = jnp.transpose(ok_h, (0, 1, 3, 2, 4)).reshape(grid_b, H * R, H * R)
    return jnp.where(ok_h, 0.0, NEG_INF).astype(jnp.float32)


def encoder_block(x, src_mask, prepped, *, batch_parallel=None):
    (w_big, w1, w2, b1, vec_pack) = prepped
    if batch_parallel is None:
        # Only real generation-specific lever: occupy both TensorCores on v7x.
        try:
            kind = jax.devices()[0].device_kind.lower()
        except Exception:
            kind = ""
        batch_parallel = ("v7" in kind) or ("7x" in kind)

    xf = x.reshape(BS, D)                         # free, contiguous reshape
    grid_b = B if batch_parallel else 1
    bias = build_attention_bias(src_mask, grid_b)
    out_shape = jax.ShapeDtypeStruct((BS, D), jnp.float32)

    if grid_b == 1:
        # Collapsed path (v5e / v6e): grid-less call — everything resident in
        # VMEM once, no double-buffering, no pipeline bookkeeping.
        out = pl.pallas_call(encoder_block_kernel, out_shape=out_shape)(
            xf, bias, w_big, w1, w2, b1, vec_pack)
    else:
        # v7x path: one batch per grid step, parallel over the 2 TensorCores.
        R = S
        HR = H * R
        out = pl.pallas_call(
            encoder_block_kernel,
            out_shape=out_shape,
            grid=(grid_b,),
            in_specs=[
                pl.BlockSpec((R, D), lambda g: (g, 0)),           # x rows of batch g
                pl.BlockSpec((1, HR, HR), lambda g: (g, 0, 0)),   # per-batch bias
                pl.BlockSpec(w_big.shape, lambda g: (0, 0)),
                pl.BlockSpec(w1.shape, lambda g: (0, 0)),
                pl.BlockSpec(w2.shape, lambda g: (0, 0)),
                pl.BlockSpec(b1.shape, lambda g: (0, 0)),
                pl.BlockSpec(vec_pack.shape, lambda g: (0, 0)),
            ],
            out_specs=pl.BlockSpec((R, D), lambda g: (g, 0)),
            compiler_params=pltpu.CompilerParams(
                dimension_semantics=("parallel",)),
        )(xf, bias, w_big, w1, w2, b1, vec_pack)
    return out.reshape(B, S, D)


# ----- pure-JAX reference for a correctness sanity check -----
def encoder_block_ref(x, src_mask, params):
    (wq, wk, wv, wo, w1, b1, w2, b2, g1, be1, g2, be2) = params

    def ln(z, g, bb):
        mu = jnp.mean(z, -1, keepdims=True)
        var = jnp.mean((z - mu) ** 2, -1, keepdims=True)
        return (z - mu) / jnp.sqrt(var + EPS) * g + bb

    xn = ln(x, g1, be1)
    q = xn @ wq
    k = xn @ wk
    v = xn @ wv
    qh = q.reshape(B, S, H, DK).transpose(0, 2, 1, 3)
    kh = k.reshape(B, S, H, DK).transpose(0, 2, 1, 3)
    vh = v.reshape(B, S, H, DK).transpose(0, 2, 1, 3)
    scores = jnp.einsum("bhqd,bhkd->bhqk", qh, kh) / (DK ** 0.5)
    scores = jnp.where(src_mask[:, None, :, :] == 0, -1e9, scores)
    p = jax.nn.softmax(scores, axis=-1)
    attn = jnp.einsum("bhqk,bhkd->bhqd", p, vh).transpose(0, 2, 1, 3).reshape(B, S, D)
    x1 = x + attn @ wo
    xn2 = ln(x1, g2, be2)
    ff = jnp.maximum(xn2 @ w1 + b1, 0.0) @ w2 + b2
    return x1 + ff


if __name__ == "__main__":
    key = jax.random.PRNGKey(0)
    ks = jax.random.split(key, 10)

    x = jax.random.normal(ks[0], (B, S, D), jnp.float32)
    # src_mask: batch 0 fully visible, batch 1 has last two positions padded out.
    src_mask = jnp.ones((B, 1, S), jnp.int32)
    src_mask = src_mask.at[1, 0, S - 2:].set(0)

    sc = 0.1
    wq = sc * jax.random.normal(ks[1], (D, D), jnp.float32)
    wk = sc * jax.random.normal(ks[2], (D, D), jnp.float32)
    wv = sc * jax.random.normal(ks[3], (D, D), jnp.float32)
    wo = sc * jax.random.normal(ks[4], (D, D), jnp.float32)
    w1 = sc * jax.random.normal(ks[5], (D, DFF), jnp.float32)
    b1 = sc * jax.random.normal(ks[6], (1, DFF), jnp.float32)
    w2 = sc * jax.random.normal(ks[7], (DFF, D), jnp.float32)
    b2 = sc * jax.random.normal(ks[8], (1, D), jnp.float32)
    g1 = jnp.ones((1, D), jnp.float32)
    be1 = jnp.zeros((1, D), jnp.float32)
    g2 = jnp.ones((1, D), jnp.float32)
    be2 = jnp.zeros((1, D), jnp.float32)
    params = (wq, wk, wv, wo, w1, b1, w2, b2, g1, be1, g2, be2)

    # One-time host-side parameter preparation (QKV packing, Wo folded into Wv,
    # 1/sqrt(dk) folded into Wq, small vectors packed).
    prepped = jax.block_until_ready(prepare_params(params))

    out = encoder_block(x, src_mask, prepped)
    out = jax.block_until_ready(out)

    ref = encoder_block_ref(x, src_mask, params)
    assert out.shape == (B, S, D)
    # Exact softmax reciprocal restored (review opt 7): expected error is at
    # f32/MXU rounding level (~1e-5 typical).  Assert at 1e-3 (10x tighter than
    # before) to stay robust across MXU precision modes; real bugs show O(0.1+).
    err = jnp.max(jnp.abs(out - ref))
    assert jnp.allclose(out, ref, rtol=1e-3, atol=1e-3), f"max err {err}"

    print("KERNEL_OK")
</pallas_src>

<mosaic_0001>
module attributes {stable_mosaic.version = 11 : i64} {
  func.func @encoder_block_kernel(%arg0: memref<16x32xf32, #tpu.memory_space<vmem>>, %arg1: memref<1x64x64xf32, #tpu.memory_space<vmem>>, %arg2: memref<32x192xf32, #tpu.memory_space<vmem>>, %arg3: memref<32x64xf32, #tpu.memory_space<vmem>>, %arg4: memref<64x32xf32, #tpu.memory_space<vmem>>, %arg5: memref<1x64xf32, #tpu.memory_space<vmem>>, %arg6: memref<5x32xf32, #tpu.memory_space<vmem>>, %arg7: memref<16x32xf32, #tpu.memory_space<vmem>>) attributes {dimension_semantics = [], scalar_prefetch = 0 : i64, scratch_operands = 0 : i64, tpu.core_type = #tpu.core_type<tc>} {
    %c0 = arith.constant 0 : index
    %c0_0 = arith.constant 0 : index
    %0 = vector.load %arg0[%c0, %c0_0] : memref<16x32xf32, #tpu.memory_space<vmem>>, vector<16x32xf32>
    %c0_1 = arith.constant 0 : index
    %c0_2 = arith.constant 0 : index
    %c0_3 = arith.constant 0 : index
    %1 = vector.load %arg1[%c0_1, %c0_2, %c0_3] : memref<1x64x64xf32, #tpu.memory_space<vmem>>, vector<1x64x64xf32>
    %2 = vector.shape_cast %1 : vector<1x64x64xf32> to vector<64x64xf32>
    %c0_4 = arith.constant 0 : index
    %c0_5 = arith.constant 0 : index
    %3 = vector.load %arg6[%c0_4, %c0_5] : memref<5x32xf32, #tpu.memory_space<vmem>>, vector<1x32xf32>
    %c1 = arith.constant 1 : index
    %c0_6 = arith.constant 0 : index
    %4 = vector.load %arg6[%c1, %c0_6] : memref<5x32xf32, #tpu.memory_space<vmem>>, vector<1x32xf32>
    %c2 = arith.constant 2 : index
    %c0_7 = arith.constant 0 : index
    %5 = vector.load %arg6[%c2, %c0_7] : memref<5x32xf32, #tpu.memory_space<vmem>>, vector<1x32xf32>
    %c3 = arith.constant 3 : index
    %c0_8 = arith.constant 0 : index
    %6 = vector.load %arg6[%c3, %c0_8] : memref<5x32xf32, #tpu.memory_space<vmem>>, vector<1x32xf32>
    %c4 = arith.constant 4 : index
    %c0_9 = arith.constant 0 : index
    %7 = vector.load %arg6[%c4, %c0_9] : memref<5x32xf32, #tpu.memory_space<vmem>>, vector<1x32xf32>
    %cst = arith.constant dense<0.000000e+00> : vector<16xf32>
    %8 = vector.multi_reduction <add>, %0, %cst [1] : vector<16x32xf32> to vector<16xf32>
    %9 = vector.shape_cast %8 : vector<16xf32> to vector<16x1xf32>
    %cst_10 = arith.constant 3.200000e+01 : f32
    %10 = vector.broadcast %cst_10 : f32 to vector<16x1xf32>
    %11 = arith.divf %9, %10 : vector<16x1xf32>
    %12 = vector.broadcast %11 : vector<16x1xf32> to vector<16x32xf32>
    %13 = arith.subf %0, %12 : vector<16x32xf32>
    %14 = arith.mulf %13, %13 : vector<16x32xf32>
    %cst_11 = arith.constant dense<0.000000e+00> : vector<16xf32>
    %15 = vector.multi_reduction <add>, %14, %cst_11 [1] : vector<16x32xf32> to vector<16xf32>
    %16 = vector.shape_cast %15 : vector<16xf32> to vector<16x1xf32>
    %cst_12 = arith.constant 3.200000e+01 : f32
    %17 = vector.broadcast %cst_12 : f32 to vector<16x1xf32>
    %18 = arith.divf %16, %17 : vector<16x1xf32>
    %cst_13 = arith.constant 9.99999997E-7 : f32
    %19 = vector.broadcast %cst_13 : f32 to vector<16x1xf32>
    %20 = arith.addf %18, %19 : vector<16x1xf32>
    %21 = math.rsqrt %20 : vector<16x1xf32>
    %22 = vector.broadcast %21 : vector<16x1xf32> to vector<16x32xf32>
    %23 = arith.mulf %13, %22 : vector<16x32xf32>
    %24 = vector.broadcast %3 : vector<1x32xf32> to vector<16x32xf32>
    %25 = arith.mulf %23, %24 : vector<16x32xf32>
    %26 = vector.broadcast %4 : vector<1x32xf32> to vector<16x32xf32>
    %27 = arith.addf %25, %26 : vector<16x32xf32>
    %c0_14 = arith.constant 0 : index
    %c0_15 = arith.constant 0 : index
    %28 = vector.load %arg2[%c0_14, %c0_15] : memref<32x192xf32, #tpu.memory_space<vmem>>, vector<32x192xf32>
    %cst_16 = arith.constant dense<0.000000e+00> : vector<16x192xf32>
    %29 = tpu.matmul %27, %28, %cst_16 {dimension_numbers = #tpu.dot_dimension_numbers<[1], [0], [0], [1], [0, 0, 1, 1], [], []>} : vector<16x32xf32>, vector<32x192xf32>, vector<16x192xf32> -> vector<16x192xf32>
    %30 = vector.extract_strided_slice %29 {offsets = [0, 0], sizes = [16, 8], strides = [1, 1]} : vector<16x192xf32> to vector<16x8xf32>
    %31 = vector.extract_strided_slice %29 {offsets = [0, 8], sizes = [16, 8], strides = [1, 1]} : vector<16x192xf32> to vector<16x8xf32>
    %32 = vector.extract_strided_slice %29 {offsets = [0, 16], sizes = [16, 8], strides = [1, 1]} : vector<16x192xf32> to vector<16x8xf32>
    %33 = vector.extract_strided_slice %29 {offsets = [0, 24], sizes = [16, 8], strides = [1, 1]} : vector<16x192xf32> to vector<16x8xf32>
    %34 = tpu.concatenate %30, %31, %32, %33 in 0 : vector<16x8xf32>, vector<16x8xf32>, vector<16x8xf32>, vector<16x8xf32> -> vector<64x8xf32>
    %35 = vector.extract_strided_slice %29 {offsets = [0, 32], sizes = [16, 8], strides = [1, 1]} : vector<16x192xf32> to vector<16x8xf32>
    %36 = vector.extract_strided_slice %29 {offsets = [0, 40], sizes = [16, 8], strides = [1, 1]} : vector<16x192xf32> to vector<16x8xf32>
    %37 = vector.extract_strided_slice %29 {offsets = [0, 48], sizes = [16, 8], strides = [1, 1]} : vector<16x192xf32> to vector<16x8xf32>
    %38 = vector.extract_strided_slice %29 {offsets = [0, 56], sizes = [16, 8], strides = [1, 1]} : vector<16x192xf32> to vector<16x8xf32>
    %39 = tpu.concatenate %35, %36, %37, %38 in 0 : vector<16x8xf32>, vector<16x8xf32>, vector<16x8xf32>, vector<16x8xf32> -> vector<64x8xf32>
    %40 = vector.extract_strided_slice %29 {offsets = [0, 64], sizes = [16, 32], strides = [1, 1]} : vector<16x192xf32> to vector<16x32xf32>
    %41 = vector.extract_strided_slice %29 {offsets = [0, 96], sizes = [16, 32], strides = [1, 1]} : vector<16x192xf32> to vector<16x32xf32>
    %42 = vector.extract_strided_slice %29 {offsets = [0, 128], sizes = [16, 32], strides = [1, 1]} : vector<16x192xf32> to vector<16x32xf32>
    %43 = vector.extract_strided_slice %29 {offsets = [0, 160], sizes = [16, 32], strides = [1, 1]} : vector<16x192xf32> to vector<16x32xf32>
    %44 = tpu.concatenate %40, %41, %42, %43 in 0 : vector<16x32xf32>, vector<16x32xf32>, vector<16x32xf32>, vector<16x32xf32> -> vector<64x32xf32>
    %cst_17 = arith.constant dense<0.000000e+00> : vector<64x64xf32>
    %45 = tpu.matmul %34, %39, %cst_17 {dimension_numbers = #tpu.dot_dimension_numbers<[1], [1], [0], [0], [0, 0, 1, 0], [], []>} : vector<64x8xf32>, vector<64x8xf32>, vector<64x64xf32> -> vector<64x64xf32>
    %46 = arith.addf %45, %2 : vector<64x64xf32>
    %cst_18 = arith.constant dense<0xFF800000> : vector<64xf32>
    %47 = vector.multi_reduction <maximumf>, %46, %cst_18 [1] : vector<64x64xf32> to vector<64xf32>
    %48 = vector.shape_cast %47 : vector<64xf32> to vector<64x1xf32>
    %49 = vector.broadcast %48 : vector<64x1xf32> to vector<64x64xf32>
    %50 = arith.subf %46, %49 : vector<64x64xf32>
    %51 = math.exp %50 : vector<64x64xf32>
    %cst_19 = arith.constant dense<0.000000e+00> : vector<64xf32>
    %52 = vector.multi_reduction <add>, %51, %cst_19 [1] : vector<64x64xf32> to vector<64xf32>
    %53 = vector.shape_cast %52 : vector<64xf32> to vector<64x1xf32>
    %cst_20 = arith.constant dense<0.000000e+00> : vector<64x32xf32>
    %54 = tpu.matmul %51, %44, %cst_20 {dimension_numbers = #tpu.dot_dimension_numbers<[1], [0], [0], [1], [0, 0, 1, 1], [], []>} : vector<64x64xf32>, vector<64x32xf32>, vector<64x32xf32> -> vector<64x32xf32>
    %cst_21 = arith.constant 1.000000e+00 : f32
    %55 = vector.broadcast %cst_21 : f32 to vector<64x1xf32>
    %56 = arith.divf %55, %53 : vector<64x1xf32>
    %57 = vector.broadcast %56 : vector<64x1xf32> to vector<64x32xf32>
    %58 = arith.mulf %54, %57 : vector<64x32xf32>
    %59 = vector.extract_strided_slice %58 {offsets = [0, 0], sizes = [16, 32], strides = [1, 1]} : vector<64x32xf32> to vector<16x32xf32>
    %60 = vector.extract_strided_slice %58 {offsets = [16, 0], sizes = [16, 32], strides = [1, 1]} : vector<64x32xf32> to vector<16x32xf32>
    %61 = arith.addf %59, %60 : vector<16x32xf32>
    %62 = vector.extract_strided_slice %58 {offsets = [32, 0], sizes = [16, 32], strides = [1, 1]} : vector<64x32xf32> to vector<16x32xf32>
    %63 = arith.addf %61, %62 : vector<16x32xf32>
    %64 = vector.extract_strided_slice %58 {offsets = [48, 0], sizes = [16, 32], strides = [1, 1]} : vector<64x32xf32> to vector<16x32xf32>
    %65 = arith.addf %63, %64 : vector<16x32xf32>
    %66 = arith.addf %0, %65 : vector<16x32xf32>
    %cst_22 = arith.constant dense<0.000000e+00> : vector<16xf32>
    %67 = vector.multi_reduction <add>, %66, %cst_22 [1] : vector<16x32xf32> to vector<16xf32>
    %68 = vector.shape_cast %67 : vector<16xf32> to vector<16x1xf32>
    %cst_23 = arith.constant 3.200000e+01 : f32
    %69 = vector.broadcast %cst_23 : f32 to vector<16x1xf32>
    %70 = arith.divf %68, %69 : vector<16x1xf32>
    %71 = vector.broadcast %70 : vector<16x1xf32> to vector<16x32xf32>
    %72 = arith.subf %66, %71 : vector<16x32xf32>
    %73 = arith.mulf %72, %72 : vector<16x32xf32>
    %cst_24 = arith.constant dense<0.000000e+00> : vector<16xf32>
    %74 = vector.multi_reduction <add>, %73, %cst_24 [1] : vector<16x32xf32> to vector<16xf32>
    %75 = vector.shape_cast %74 : vector<16xf32> to vector<16x1xf32>
    %cst_25 = arith.constant 3.200000e+01 : f32
    %76 = vector.broadcast %cst_25 : f32 to vector<16x1xf32>
    %77 = arith.divf %75, %76 : vector<16x1xf32>
    %cst_26 = arith.constant 9.99999997E-7 : f32
    %78 = vector.broadcast %cst_26 : f32 to vector<16x1xf32>
    %79 = arith.addf %77, %78 : vector<16x1xf32>
    %80 = math.rsqrt %79 : vector<16x1xf32>
    %81 = vector.broadcast %80 : vector<16x1xf32> to vector<16x32xf32>
    %82 = arith.mulf %72, %81 : vector<16x32xf32>
    %83 = vector.broadcast %5 : vector<1x32xf32> to vector<16x32xf32>
    %84 = arith.mulf %82, %83 : vector<16x32xf32>
    %85 = vector.broadcast %6 : vector<1x32xf32> to vector<16x32xf32>
    %86 = arith.addf %84, %85 : vector<16x32xf32>
    %c0_27 = arith.constant 0 : index
    %c0_28 = arith.constant 0 : index
    %87 = vector.load %arg3[%c0_27, %c0_28] : memref<32x64xf32, #tpu.memory_space<vmem>>, vector<32x64xf32>
    %cst_29 = arith.constant dense<0.000000e+00> : vector<16x64xf32>
    %88 = tpu.matmul %86, %87, %cst_29 {dimension_numbers = #tpu.dot_dimension_numbers<[1], [0], [0], [1], [0, 0, 1, 1], [], []>} : vector<16x32xf32>, vector<32x64xf32>, vector<16x64xf32> -> vector<16x64xf32>
    %c0_30 = arith.constant 0 : index
    %c0_31 = arith.constant 0 : index
    %89 = vector.load %arg5[%c0_30, %c0_31] : memref<1x64xf32, #tpu.memory_space<vmem>>, vector<1x64xf32>
    %90 = vector.broadcast %89 : vector<1x64xf32> to vector<16x64xf32>
    %91 = arith.addf %88, %90 : vector<16x64xf32>
    %cst_32 = arith.constant 0.000000e+00 : f32
    %92 = vector.broadcast %cst_32 : f32 to vector<16x64xf32>
    %93 = arith.maximumf %91, %92 : vector<16x64xf32>
    %c0_33 = arith.constant 0 : index
    %c0_34 = arith.constant 0 : index
    %94 = vector.load %arg4[%c0_33, %c0_34] : memref<64x32xf32, #tpu.memory_space<vmem>>, vector<64x32xf32>
    %cst_35 = arith.constant dense<0.000000e+00> : vector<16x32xf32>
    %95 = tpu.matmul %93, %94, %cst_35 {dimension_numbers = #tpu.dot_dimension_numbers<[1], [0], [0], [1], [0, 0, 1, 1], [], []>} : vector<16x64xf32>, vector<64x32xf32>, vector<16x32xf32> -> vector<16x32xf32>
    %96 = vector.broadcast %7 : vector<1x32xf32> to vector<16x32xf32>
    %97 = arith.addf %95, %96 : vector<16x32xf32>
    %98 = arith.addf %66, %97 : vector<16x32xf32>
    %c0_36 = arith.constant 0 : index
    %c0_37 = arith.constant 0 : index
    %99 = vector.load %arg7[%c0_36, %c0_37] : memref<16x32xf32, #tpu.memory_space<vmem>>, vector<16x32xf32>
    tpu.vector_store %arg7[%c0_36, %c0_37], %98 {strides = array<i32>} : memref<16x32xf32, #tpu.memory_space<vmem>>, vector<16x32xf32>,
    return
  }
}

</mosaic_0001>

<bundles_post_ra>
// kernel: tpu_custom_call.1
= control target key start
LH: loop header
LB: loop body
LE: loop exit
PB: predicated region body
PF: predicated region fallthrough
CT: control target
= control target key end

     0   :  { %12 = vsyncpa [#allocation3], 0  ;;  %s1462_s0 = inlined_call_operand.hbm [shape: f32[16,32], index: 0, kind: input, shape index: {}]   ;;  %s1463_s1 = inlined_call_operand.vmem [shape: f32[1,64,64], index: 1, kind: input, shape index: {}]   ;;  %s1464_s2 = inlined_call_operand.hbm [shape: f32[32,192], index: 2, kind: input, shape index: {}]   ;;  %s1465_s3 = inlined_call_operand.vmem [shape: f32[32,64], index: 3, kind: input, shape index: {}]   ;;  %s1466_s4 = inlined_call_operand.vmem [shape: f32[64,32], index: 4, kind: input, shape index: {}]   ;;  %s1467_s5 = inlined_call_operand.vmem [shape: f32[1,64], index: 5, kind: input, shape index: {}]   ;;  %s1468_s6 = inlined_call_operand.hbm [shape: f32[5,32], index: 6, kind: input, shape index: {}]   ;;  %s1469_s7 = inlined_call_operand.hbm [shape: f32[16,32], index: 7, kind: output, shape index: {}]  }
   0x1   :  { %13 = vsyncpa [#allocation6], 0  ;;  %s34_s26 = sshll.u32 %s1464_s2, 4  ;;  %s35_s26 = int_to_ptr.hbm [resolvable:$true] %s34_s26 }
   0x2   :  { %14 = vsyncpa [#allocation4], 0  ;;  %s1011_s27 = smov [#allocation5]   ;;  %s19_s8 = sshll.u32 %s1462_s0, 4  ;;  %s20_s8 = int_to_ptr.hbm [resolvable:$true] %s19_s8 }
   0x3   :  { %s36_s28 = sshll.u32 %s1011_s27, 4  ;;  %s1012_s9 = smov 256   ;;  %s37_s28 = int_to_ptr.vmem [resolvable:$true] %s36_s28 }
   0x4   :  { %s1013_s10 = smov 16   ;;  %s1014_s11 = smov [#allocation2]  }
   0x5   :  { %42 = dma.hbm_to_vmem [thread:$0]  %s35_s26, 1024, %s37_s28, [#allocation6], %s1012_s9, %s1012_s9, %s1013_s10  }
   0x6   :  { %s21_s12 = sshll.u32 %s1014_s11, 4  ;;  %s1015_s13 = smov 128   ;;  %s22_s12 = int_to_ptr.vmem [resolvable:$true] %s21_s12 }
   0x7   :  { %s1016_s14 = smov 8   ;;  %s54_s16 = sshll.u32 %s1468_s6, 4  ;;  %s55_s16 = int_to_ptr.hbm [resolvable:$true] %s54_s16 }
   0x8   :  { %27 = dma.hbm_to_vmem [thread:$0]  %s20_s8, 256, %s22_s12, [#allocation3], %s1015_s13, %s1015_s13, %s1016_s14  }
   0x9   :  { %s1017_s17 = smov [#allocation7]  }
   0xa   :  { %s56_s0 = sshll.u32 %s1017_s17, 4  ;;  %s57_s0 = int_to_ptr.vmem [resolvable:$true] %s56_s0 }
   0xb   :  { %59 = dma.hbm_to_vmem [thread:$0]  %s55_s16, 128, %s57_s0, [#allocation6]  }
   0xc   :  { %1005 = dma.done.wait [#allocation3], 256  }
   0xd   :  { %1006 = vsyncadd [#allocation3], 4294967040 }
   0xe   :  { %1007 = dma.done.wait [#allocation6], 1152  }
   0xf   :  { %1008 = vsyncadd [#allocation6], 4294966144  ;;  %vm87_vm0 = vcmask 261120   ;;  %v1078_v0 = vld [vmem:[#allocation2] sm:$0xff]  ;;  %v1082_v2 = vld [vmem:[#allocation2 + $0x8] sm:$0xff]  ;;  %v1018_v4 = vmov 32.0  }
  0x10   :  { %v88_v1 = vsel %vm87_vm0, %v1078_v0, 0.0  ;;  %v91_v3 = vsel %vm87_vm0, %v1082_v2, 0.0  ;;  %867 = vrcp.f32 %v1018_v4  ;;  %v151_v21 = vld [vmem:[#allocation5 + $0x30] sm:$0xff]  ;;  %v152_v22 = vld [vmem:[#allocation5 + $0x38] sm:$0xff]  ;;  %v149_v23 = vld [vmem:[#allocation5 + $0x20] sm:$0xff]  ;;  %s1019_s6 = smov 112  }
  0x11   :  { %89 = vadd.xlane.f32.xlu0 %v88_v1  ;;  %171 = vmatpush.msra.mxu0 %v151_v21  ;;  %v150_v24 = vld [vmem:[#allocation5 + $0x28] sm:$0xff]  ;;  %v147_v25 = vld [vmem:[#allocation5 + $0x10] sm:$0xff]  ;;  %v148_v26 = vld [vmem:[#allocation5 + $0x18] sm:$0xff]  ;;  %s1020_s18 = smov 104   ;;  %s1021_s19 = smov 120   ;;  %vm245_vm8 = vcmask 64512  }
  0x12   :  { %194 = vmatpush.msra.mxu1 %v152_v22  ;;  %v145_v27 = vld [vmem:[#allocation5] sm:$0xff]  ;;  %v146_v28 = vld [vmem:[#allocation5 + $0x8] sm:$0xff]  ;;  %s1022_s20 = smov 96   ;;  %s1023_s21 = smov 64   ;;  %vm319_vm9 = vcmask 523264  }
  0x13   :  { %172 = vmatpush.msra.mxu0 %v149_v23  ;;  %v861_v43 = vld [vmem:[#allocation7] ss:$0 sm:$0xff]  ;;  %v862_v47 = vld [vmem:[#allocation7 + $0x1] ss:$0 sm:$0xff]  ;;  %s1024_s22 = smov 32   ;;  %s754_s0 = sshll.u32 %s1469_s7, 4  ;;  %s755_s0 = int_to_ptr.hbm [resolvable:$true] %s754_s0 }
  0x14   :  { %195 = vmatpush.msra.mxu1 %v150_v24 }
  0x15   :  { %173 = vmatpush.msra.mxu0 %v147_v25 }
  0x16   :  { %v868_v5 = vpop.eup %867  ;;  %196 = vmatpush.msra.mxu1 %v148_v26 }
  0x17   :  { %v95_v6 = vmul.f32 32.0, %v868_v5  ;;  %vm99_vm1 = vweird.f32 %v868_v5  ;;  %174 = vmatpush.msra.mxu0 %v145_v27 }
  0x18   :  { %197 = vmatpush.msra.mxu1 %v146_v28 }
  0x19   :  { %92 = vadd.xlane.f32.xlu0 %v91_v3  ;;  %v96_v7 = vsub.f32 1.0, %v95_v6 }
  0x1b   :  { %v97_v8 = vmul.f32 %v868_v5, %v96_v7 }
  0x1d   :  { %v98_v9 = vadd.f32 %v868_v5, %v97_v8 }
  0x1f   :  { %v1086_v10 = vsel %vm99_vm1, %v868_v5, %v98_v9 }
  0x84   :  { %v90_v11 = vpop.xlane.xlu0 %89 }
  0x85   :  { %v101_v12 = vmul.f32 %v1086_v10, %v90_v11 }
  0x87   :  { %v103_v13 = vsub.f32 %v1078_v0, %v101_v12 }
  0x89   :  { %v105_v14 = vmul.f32 %v103_v13, %v103_v13 }
  0x8b   :  { %v107_v15 = vsel %vm87_vm0, %v105_v14, 0.0 }
  0x8c   :  { %108 = vadd.xlane.f32.xlu1 %v107_v15  ;;  %v93_v16 = vpop.xlane.xlu0 %92 }
  0x8d   :  { %v102_v17 = vmul.f32 %v1086_v10, %v93_v16 }
  0x8f   :  { %v104_v18 = vsub.f32 %v1082_v2, %v102_v17 }
  0x91   :  { %v106_v19 = vmul.f32 %v104_v18, %v104_v18 }
  0x93   :  { %v110_v20 = vsel %vm87_vm0, %v106_v19, 0.0 }
  0x94   :  { %111 = vadd.xlane.f32.xlu1 %v110_v20 }
  0xff   :  { %v109_v29 = vpop.xlane.xlu1 %108 }
 0x100   :  { %v113_v30 = vmul.f32 %v109_v29, %v1086_v10 }
 0x102   :  { %v115_v31 = vadd.f32 1e-06, %v113_v30 }
 0x104   :  { %869 = vrsqrt.f32 %v115_v31  ;;  %vm123_vm3 = vweird.f32 %v115_v31 }
 0x107   :  { %v112_v32 = vpop.xlane.xlu1 %111 }
 0x108   :  { %v114_v33 = vmul.f32 %v112_v32, %v1086_v10  ;;  %v77_v32 = vld [vmem:[%s1463_s1 + $0x18] sm:$0xff] }
 0x10a   :  { %v870_v34 = vpop.eup %869  ;;  %v116_v35 = vadd.f32 1e-06, %v114_v33 }
 0x10b   :  { %v118_v36 = vmul.f32 %v870_v34, %v115_v31  ;;  %vm124_vm2 = vweird.f32 %v870_v34 }
 0x10c   :  { %871 = vrsqrt.f32 %v116_v35  ;;  %vm125_vm4 = vmor %vm123_vm3, %vm124_vm2  ;;  %vm133_vm6 = vweird.f32 %v116_v35 }
 0x10d   :  { %v119_v37 = vmul.f32 %v870_v34, %v118_v36 }
 0x10f   :  { %v120_v38 = vmul.f32 0.5, %v119_v37 }
 0x111   :  { %v121_v39 = vsub.f32 1.5, %v120_v38 }
 0x112   :  { %v872_v40 = vpop.eup %871 }
 0x113   :  { %v122_v41 = vmul.f32 %v870_v34, %v121_v39  ;;  %v128_v42 = vmul.f32 %v872_v40, %v116_v35  ;;  %vm134_vm5 = vweird.f32 %v872_v40 }
 0x114   :  { %vm135_vm7 = vmor %vm133_vm6, %vm134_vm5 }
 0x115   :  { %v126_v44 = vsel %vm125_vm4, %v870_v34, %v122_v41  ;;  %v129_v45 = vmul.f32 %v872_v40, %v128_v42  ;;  %v75_v34 = vld [vmem:[%s1463_s1 + $0x8] sm:$0xff]  ;;  %v76_v42 = vld [vmem:[%s1463_s1 + $0x10] sm:$0xff] }
 0x116   :  { %v137_v46 = vmul.f32 %v126_v44, %v103_v13 }
 0x117   :  { %v130_v48 = vmul.f32 0.5, %v129_v45 }
 0x118   :  { %v140_v49 = vmul.f32 %v861_v43, %v137_v46 }
 0x119   :  { %v131_v50 = vsub.f32 1.5, %v130_v48  ;;  %v79_v48 = vld [vmem:[%s1463_s1 + $0x28] sm:$0xff] }
 0x11a   :  { %v143_v51 = vadd.f32 %v862_v47, %v140_v49 }
 0x11b   :  { %v132_v52 = vmul.f32 %v872_v40, %v131_v50 }
 0x11c   :  { %768 = vmatmul.msk.f32.vlgmr.msra.gmra.mxu0 %vm87_vm0, %v143_v51  ;;  %770 = vmatmul.msk.f32.vlgmr.msra.gmra.mxu1 %vm87_vm0, %v143_v51 }
 0x11d   :  { %v136_v53 = vsel %vm135_vm7, %v872_v40, %v132_v52  ;;  %v78_v40 = vld [vmem:[%s1463_s1 + $0x20] sm:$0xff] }
 0x11e   :  { %v138_v54 = vmul.f32 %v136_v53, %v104_v18  ;;  %v74_v52 = vld [vmem:[%s1463_s1] sm:$0xff]  ;;  %v80_v53 = vld [vmem:[%s1463_s1 + $0x30] sm:$0xff] }
 0x120   :  { %v141_v55 = vmul.f32 %v861_v43, %v138_v54 }
 0x122   :  { %v144_v56 = vadd.f32 %v862_v47, %v141_v55 }
 0x124   :  { %769 = vmatmul.msk.f32.gmra.mxu0 %vm87_vm0, %v144_v56  ;;  %771 = vmatmul.msk.f32.gmra.mxu1 %vm87_vm0, %v144_v56 }
 0x199   :  { %v1100_v57 = vpop.f32.mrf.mxu0  ;;  %v199_v63 = vpop.f32.mrf.mxu1 }
 0x19a   :  { %211 = vrot.lane.b32.xlu1 %v1100_v57, %s1019_s6 }
 0x1a1   :  { %v1103_v58 = vpop.f32.mrf.mxu0  ;;  %v202_v3 = vpop.f32.mrf.mxu1 }
 0x1a2   :  { %213 = vrot.lane.b32.xlu0 %v1103_v58, %s1019_s6  ;;  %217 = vrot.lane.b32.xlu2 %v1103_v58, %s1020_s18  ;;  %v836_v4 = vpack.i.bf16 %v199_v63, %v202_v3  ;;  %v856_v18 = vpack.i.bf16 %v1100_v57, %v1103_v58 }
 0x1aa   :  { %215 = vrot.lane.b32.xlu2 %v1100_v57, %s1020_s18 }
 0x1b2   :  { %209 = vrot.lane.b32.xlu2 %v1103_v58, %s1021_s19 }
 0x1ba   :  { %207 = vrot.lane.b32.xlu2 %v1100_v57, %s1021_s19 }
 0x1fc   :  { %v218_v59 = vpop.permute.xlu2 %217 }
 0x1fd   :  { %243 = vrot.lane.b32.xlu2 %v218_v59, %s1022_s20 }
 0x204   :  { %v216_v60 = vpop.permute.xlu2 %215 }
 0x205   :  { %241 = vrot.lane.b32.xlu0 %v216_v60, %s1022_s20 }
 0x20c   :  { %v210_v61 = vpop.permute.xlu2 %209  ;;  %v212_v62 = vpop.permute.xlu1 %211 }
 0x20d   :  { %235 = vrot.lane.b32.xlu0 %v210_v61, %s1022_s20  ;;  %237 = vrot.lane.b32.xlu1 %v212_v62, %s1022_s20 }
 0x214   :  { %v214_v1 = vpop.permute.xlu0 %213  ;;  %v208_v5 = vpop.permute.xlu2 %207 }
 0x215   :  { %239 = vrot.lane.b32.xlu2 %v214_v1, %s1022_s20  ;;  %219 = vrot.lane.b32.xlu0 %v1100_v57, %s1022_s20 }
 0x216   :  { %221 = vrot.lane.b32.xlu1 %v1103_v58, %s1022_s20 }
 0x21d   :  { %233 = vrot.lane.b32.xlu2 %v208_v5, %s1022_s20 }
 0x21e   :  { %837 = vrot.lane.b32.xlu1 %v836_v4, %s1023_s21 }
 0x225   :  { %832 = vrot.lane.b32.xlu2 %v836_v4, %s1024_s22 }
 0x257   :  { %v244_v6 = vpop.permute.xlu2 %243 }
 0x258   :  { %772 = vmatpush.xpose.msk.msrb.mxu0 %vm245_vm8, %v244_v6  ;;  %800 = vmatpush.xpose.msk.msra.mxu2 %vm245_vm8, %v244_v6 }
 0x26f   :  { %v240_v7 = vpop.permute.xlu2 %239 }
 0x277   :  { %v242_v8 = vpop.permute.xlu0 %241  ;;  %v234_v9 = vpop.permute.xlu2 %233 }
 0x278   :  { %773 = vmatpush.xpose.msk.msrb.mxu0 %vm245_vm8, %v242_v8  ;;  %801 = vmatpush.xpose.msk.msra.mxu2 %vm245_vm8, %v242_v8 }
 0x27c   :  { %774 = vmatpush.xpose.msk.msrb.mxu0 %vm245_vm8, %v240_v7  ;;  %802 = vmatpush.xpose.msk.msra.mxu2 %vm245_vm8, %v240_v7 }
 0x27f   :  { %v236_v11 = vpop.permute.xlu0 %235  ;;  %v833_v12 = vpop.permute.xlu2 %832 }
 0x280   :  { %v238_v13 = vpop.permute.xlu1 %237  ;;  %842 = vrot.lane.b32.xlu0 %v833_v12, %s1023_s21 }
 0x281   :  { %775 = vmatpush.xpose.msk.msrb.mxu0 %vm245_vm8, %v238_v13  ;;  %803 = vmatpush.xpose.msk.msra.mxu2 %vm245_vm8, %v238_v13 }
 0x285   :  { %776 = vmatpush.xpose.msk.msrb.mxu0 %vm245_vm8, %v236_v11  ;;  %804 = vmatpush.xpose.msk.msra.mxu2 %vm245_vm8, %v236_v11 }
 0x287   :  { %v220_v14 = vpop.permute.xlu0 %219 }
 0x288   :  { %v222_v15 = vpop.permute.xlu1 %221 }
 0x289   :  { %777 = vmatpush.xpose.msk.msrb.mxu0 %vm245_vm8, %v234_v9  ;;  %805 = vmatpush.xpose.msk.msra.mxu2 %vm245_vm8, %v234_v9  ;;  %v851_v16 = vpack.i.bf16 %v220_v14, %v222_v15 }
 0x28b   :  { %852 = vrot.lane.b32.xlu0 %v851_v16, %s1023_s21 }
 0x28d   :  { %778 = vmatpush.xpose.msk.msrb.mxu0 %vm245_vm8, %v222_v15  ;;  %806 = vmatpush.xpose.msk.msra.mxu2 %vm245_vm8, %v222_v15 }
 0x290   :  { %v838_v17 = vpop.permute.xlu1 %837 }
 0x291   :  { %779 = vmatpush.xpose.msk.msrb.mxu0 %vm245_vm8, %v220_v14  ;;  %807 = vmatpush.xpose.msk.msra.mxu2 %vm245_vm8, %v220_v14 }
 0x292   :  { %847 = vrot.lane.b32.xlu1 %v838_v17, %s1023_s21 }
 0x293   :  { %857 = vrot.lane.b32.xlu0 %v856_v18, %s1023_s21 }
 0x294   :  { %780 = vmatmul.msk.f32.vlgmr.msrb.gmra.mxu0 %vm245_vm8, %v1100_v57  ;;  %783 = vmatmul.msk.f32.vlgmr.msra.gmra.mxu2 %vm245_vm8, %v210_v61 }
 0x29c   :  { %781 = vmatmul.msk.f32.gmra.mxu0 %vm245_vm8, %v1103_v58  ;;  %784 = vmatmul.msk.f32.gmra.mxu2 %vm245_vm8, %v212_v62 }
 0x2a4   :  { %782 = vmatmul.msk.f32.gmra.mxu0 %vm245_vm8, %v208_v5  ;;  %785 = vmatmul.msk.f32.gmra.mxu2 %vm245_vm8, %v214_v1 }
 0x2ac   :  { %786 = vmatmul.msk.f32.gmra.mxu2 %vm245_vm8, %v216_v60 }
 0x2b4   :  { %787 = vmatmul.msk.f32.gmra.mxu2 %vm245_vm8, %v218_v59  ;;  %v81_v59 = vld [vmem:[%s1463_s1 + $0x38] sm:$0xff] }
 0x2f2   :  { %v843_v19 = vpop.permute.xlu0 %842 }
 0x2f3   :  { %v844_v20 = vunpack.i.l.bf16 %v843_v19  ;;  %v845_v21 = vunpack.i.h.bf16 %v843_v19 }
 0x2f5   :  { %448 = vmatpush.msrb.mxu1 %v844_v20  ;;  %808 = vmatpush.msra.mxu3 %v844_v20 }
 0x2f7   :  { %449 = vmatpush.msrb.mxu1 %v845_v21  ;;  %809 = vmatpush.msra.mxu3 %v845_v21 }
 0x2fd   :  { %v853_v22 = vpop.permute.xlu0 %852 }
 0x2fe   :  { %v854_v26 = vunpack.i.l.bf16 %v853_v22  ;;  %v855_v28 = vunpack.i.h.bf16 %v853_v22 }
 0x304   :  { %v848_v23 = vpop.permute.xlu1 %847 }
 0x305   :  { %v849_v24 = vunpack.i.l.bf16 %v848_v23  ;;  %v850_v25 = vunpack.i.h.bf16 %v848_v23  ;;  %v858_v27 = vpop.permute.xlu0 %857 }
 0x306   :  { %v859_v29 = vunpack.i.l.bf16 %v858_v27  ;;  %v860_v31 = vunpack.i.h.bf16 %v858_v27 }
 0x307   :  { %450 = vmatpush.msrb.mxu1 %v849_v24  ;;  %810 = vmatpush.msra.mxu3 %v849_v24 }
 0x309   :  { %451 = vmatpush.msrb.mxu1 %v850_v25  ;;  %811 = vmatpush.msra.mxu3 %v850_v25 }
 0x30b   :  { %452 = vmatpush.msrb.mxu1 %v854_v26  ;;  %812 = vmatpush.msra.mxu3 %v854_v26 }
 0x30d   :  { %453 = vmatpush.msrb.mxu1 %v855_v28  ;;  %813 = vmatpush.msra.mxu3 %v855_v28 }
 0x30f   :  { %454 = vmatpush.msrb.mxu1 %v859_v29  ;;  %814 = vmatpush.msra.mxu3 %v859_v29 }
 0x311   :  { %v295_v30 = vpop.f32.mrf.mxu0  ;;  %455 = vmatpush.msrb.mxu1 %v860_v31  ;;  %815 = vmatpush.msra.mxu3 %v860_v31 }
 0x312   :  { %v296_v55 = vadd.f32 %v295_v30, %v74_v52 }
 0x314   :  { %v320_v58 = vsel %vm319_vm9, %v296_v55, -inf }
 0x317   :  { %v304_v33 = vpop.f32.mrf.mxu2 }
 0x318   :  { %v305_v35 = vadd.f32 %v304_v33, %v77_v32 }
 0x319   :  { %v298_v36 = vpop.f32.mrf.mxu0 }
 0x31a   :  { %v299_v37 = vadd.f32 %v298_v36, %v75_v34  ;;  %v329_v38 = vsel %vm319_vm9, %v305_v35, -inf }
 0x31b   :  { %330 = vmax.xlane.f32.xlu0 %v329_v38 }
 0x31c   :  { %v323_v39 = vsel %vm319_vm9, %v299_v37, -inf }
 0x31d   :  { %324 = vmax.xlane.f32.xlu2 %v323_v39 }
 0x31f   :  { %v307_v41 = vpop.f32.mrf.mxu2 }
 0x320   :  { %v308_v43 = vadd.f32 %v307_v41, %v78_v40 }
 0x321   :  { %v301_v44 = vpop.f32.mrf.mxu0 }
 0x322   :  { %v302_v45 = vadd.f32 %v301_v44, %v76_v42  ;;  %v332_v46 = vsel %vm319_vm9, %v308_v43, -inf }
 0x324   :  { %v326_v47 = vsel %vm319_vm9, %v302_v45, -inf }
 0x325   :  { %333 = vmax.xlane.f32.xlu2 %v332_v46  ;;  %327 = vmax.xlane.f32.xlu1 %v326_v47 }
 0x327   :  { %v310_v49 = vpop.f32.mrf.mxu2 }
 0x328   :  { %v311_v50 = vadd.f32 %v310_v49, %v79_v48 }
 0x32a   :  { %v335_v51 = vsel %vm319_vm9, %v311_v50, -inf }
 0x32d   :  { %336 = vmax.xlane.f32.xlu2 %v335_v51 }
 0x32f   :  { %v313_v54 = vpop.f32.mrf.mxu2 }
 0x330   :  { %v314_v56 = vadd.f32 %v313_v54, %v80_v53 }
 0x332   :  { %v338_v57 = vsel %vm319_vm9, %v314_v56, -inf }
 0x333   :  { %339 = vmax.xlane.f32.xlu1 %v338_v57 }
 0x335   :  { %321 = vmax.xlane.f32.xlu2 %v320_v58 }
 0x337   :  { %v316_v60 = vpop.f32.mrf.mxu2 }
 0x338   :  { %v317_v61 = vadd.f32 %v316_v60, %v81_v59 }
 0x33a   :  { %v341_v62 = vsel %vm319_vm9, %v317_v61, -inf }
 0x33b   :  { %342 = vmax.xlane.f32.xlu1 %v341_v62 }
 0x38e   :  { %v331_v4 = vpop.xlane.xlu0 %330 }
 0x38f   :  { %v347_v11 = vsub.f32 %v305_v35, %v331_v4 }
 0x390   :  { %v325_v63 = vpop.xlane.xlu2 %324 }
 0x391   :  { %v345_v1 = vsub.f32 %v299_v37, %v325_v63  ;;  %v358_v14 = vmul.f32 1.442695, %v347_v11 }
 0x393   :  { %v354_v3 = vmul.f32 1.442695, %v345_v1 }
 0x395   :  { %873 = vpow2.f32 %v354_v3 }
 0x398   :  { %v334_v5 = vpop.xlane.xlu2 %333  ;;  %v328_v6 = vpop.xlane.xlu1 %327 }
 0x399   :  { %v348_v7 = vsub.f32 %v308_v43, %v334_v5  ;;  %v346_v8 = vsub.f32 %v302_v45, %v328_v6 }
 0x39b   :  { %v874_v9 = vpop.eup %873  ;;  %v360_v12 = vmul.f32 1.442695, %v348_v7  ;;  %v356_v13 = vmul.f32 1.442695, %v346_v8 }
 0x39c   :  { %789 = vmatmul.msk.f32.vlgmr.msra.gmra.mxu3 %vm319_vm9, %v874_v9  ;;  %v371_v27 = vsel %vm319_vm9, %v874_v9, 0.0 }
 0x39d   :  { %875 = vpow2.f32 %v360_v12 }
 0x39e   :  { %877 = vpow2.f32 %v356_v13 }
 0x39f   :  { %879 = vpow2.f32 %v358_v14 }
 0x3a0   :  { %v337_v15 = vpop.xlane.xlu2 %336 }
 0x3a1   :  { %v349_v28 = vsub.f32 %v311_v50, %v337_v15 }
 0x3a3   :  { %v876_v16 = vpop.eup %875  ;;  %v362_v33 = vmul.f32 1.442695, %v349_v28 }
 0x3a4   :  { %v878_v17 = vpop.eup %877  ;;  %v380_v18 = vsel %vm319_vm9, %v876_v16, 0.0 }
 0x3a5   :  { %790 = vmatmul.msk.f32.gmra.mxu3 %vm319_vm9, %v878_v17  ;;  %381 = vadd.xlane.f32.xlu1 %v380_v18  ;;  %v374_v19 = vsel %vm319_vm9, %v878_v17, 0.0  ;;  %v880_v22 = vpop.eup %879 }
 0x3a6   :  { %375 = vadd.xlane.f32.xlu2 %v374_v19  ;;  %v340_v20 = vpop.xlane.xlu1 %339  ;;  %v377_v26 = vsel %vm319_vm9, %v880_v22, 0.0 }
 0x3a7   :  { %v350_v24 = vsub.f32 %v314_v56, %v340_v20 }
 0x3a8   :  { %v322_v21 = vpop.xlane.xlu2 %321 }
 0x3a9   :  { %v344_v23 = vsub.f32 %v296_v55, %v322_v21  ;;  %v364_v29 = vmul.f32 1.442695, %v350_v24 }
 0x3ab   :  { %v352_v25 = vmul.f32 1.442695, %v344_v23 }
 0x3ad   :  { %881 = vpow2.f32 %v352_v25  ;;  %791 = vmatmul.msk.f32.gmra.mxu3 %vm319_vm9, %v880_v22  ;;  %378 = vadd.xlane.f32.xlu1 %v377_v26 }
 0x3ae   :  { %372 = vadd.xlane.f32.xlu2 %v371_v27  ;;  %v343_v30 = vpop.xlane.xlu1 %342  ;;  %883 = vpow2.f32 %v364_v29 }
 0x3af   :  { %v351_v31 = vsub.f32 %v317_v61, %v343_v30 }
 0x3b1   :  { %v366_v32 = vmul.f32 1.442695, %v351_v31 }
 0x3b3   :  { %v882_v34 = vpop.eup %881  ;;  %885 = vpow2.f32 %v366_v32 }
 0x3b4   :  { %788 = vmatmul.msk.f32.vlgmr.msrb.gmra.mxu1 %vm319_vm9, %v882_v34  ;;  %v368_v35 = vsel %vm319_vm9, %v882_v34, 0.0  ;;  %887 = vpow2.f32 %v362_v33  ;;  %v884_v36 = vpop.eup %883 }
 0x3b5   :  { %792 = vmatmul.msk.f32.gmra.mxu3 %vm319_vm9, %v876_v16  ;;  %369 = vadd.xlane.f32.xlu0 %v368_v35  ;;  %v386_v40 = vsel %vm319_vm9, %v884_v36, 0.0 }
 0x3b9   :  { %v886_v37 = vpop.eup %885 }
 0x3ba   :  { %v389_v38 = vsel %vm319_vm9, %v886_v37, 0.0  ;;  %v888_v39 = vpop.eup %887 }
 0x3bb   :  { %390 = vadd.xlane.f32.xlu2 %v389_v38  ;;  %v383_v41 = vsel %vm319_vm9, %v888_v39, 0.0 }
 0x3bd   :  { %793 = vmatmul.msk.f32.gmra.mxu3 %vm319_vm9, %v888_v39  ;;  %387 = vadd.xlane.f32.xlu0 %v386_v40 }
 0x3c5   :  { %794 = vmatmul.msk.f32.gmra.mxu3 %vm319_vm9, %v884_v36  ;;  %384 = vadd.xlane.f32.xlu0 %v383_v41 }
 0x3cd   :  { %795 = vmatmul.msk.f32.gmra.mxu3 %vm319_vm9, %v886_v37 }
 0x418   :  { %v1195_v43 = vpop.xlane.xlu1 %381 }
 0x419   :  { %v1193_v42 = vpop.xlane.xlu2 %375  ;;  %v552_v62 = vand.u32 2147483648, %v1195_v43  ;;  %v550_v8 = vand.u32 2147483647, %v1195_v43  ;;  %vm546_vm14 = vweird.f32 %v1195_v43 }
 0x41a   :  { %889 = vrcp.f32 %v1193_v42  ;;  %v520_v1 = vand.u32 2147483647, %v1193_v42  ;;  %v522_v3 = vand.u32 2147483648, %v1193_v42  ;;  %vm516_vm10 = vweird.f32 %v1193_v42 }
 0x41b   :  { %891 = vrcp.f32 %v1195_v43  ;;  %v1247_v9 = vor.u32 1.1754944e-38, %v552_v62  ;;  %vm1303_vm7 = vcmp.eq.f32.partialorder %v550_v8, 8.507059e+37 }
 0x41c   :  { %vm1251_vm11 = vcmp.eq.f32.partialorder %v520_v1, 8.507059e+37  ;;  %v523_v14 = vor.u32 1.1754944e-38, %v522_v3  ;;  %v668_v3 = vld [vmem:[%s1465_s3 + $0x8] sm:$0xff] }
 0x41f   :  { %v1197_v44 = vpop.f32.mrf.mxu3 }
 0x420   :  { %v1202_v46 = vpop.xlane.xlu1 %378  ;;  %v1210_v49 = vpop.eup %889 }
 0x421   :  { %v1200_v45 = vpop.xlane.xlu2 %372  ;;  %v512_v50 = vmul.f32 %v1210_v49, %v1193_v42  ;;  %v1216_v51 = vpop.eup %891  ;;  %vm517_vm13 = vweird.f32 %v1210_v49  ;;  %v535_v30 = vand.u32 2147483647, %v1202_v46  ;;  %vm531_vm5 = vweird.f32 %v1202_v46 }
 0x422   :  { %v542_v60 = vmul.f32 %v1216_v51, %v1195_v43  ;;  %v507_v24 = vand.u32 2147483648, %v1200_v45  ;;  %vm547_vm2 = vweird.f32 %v1216_v51  ;;  %v505_v28 = vand.u32 2147483647, %v1200_v45  ;;  %vm1293_vm4 = vmor %vm516_vm10, %vm517_vm13 }
 0x423   :  { %v513_v58 = vsub.f32 1.0, %v512_v50  ;;  %vm501_vm3 = vweird.f32 %v1200_v45  ;;  %v537_v40 = vand.u32 2147483648, %v1202_v46 }
 0x424   :  { %v543_v7 = vsub.f32 1.0, %v542_v60  ;;  %v508_v39 = vor.u32 1.1754944e-38, %v507_v24  ;;  %vm1310_vm8 = vcmp.eq.f32.partialorder %v505_v28, 8.507059e+37 }
 0x425   :  { %v514_v6 = vmul.f32 %v1210_v49, %v513_v58 }
 0x426   :  { %v544_v27 = vmul.f32 %v1216_v51, %v543_v7 }
 0x427   :  { %v515_v21 = vadd.f32 %v1210_v49, %v514_v6  ;;  %v538_v6 = vor.u32 1.1754944e-38, %v537_v40 }
 0x428   :  { %v1205_v47 = vpop.f32.mrf.mxu3  ;;  %v1207_v48 = vpop.xlane.xlu0 %369  ;;  %v545_v42 = vadd.f32 %v1216_v51, %v544_v27 }
 0x429   :  { %893 = vrcp.f32 %v1207_v48  ;;  %v492_v18 = vand.u32 2147483648, %v1207_v48  ;;  %vm486_vm15 = vweird.f32 %v1207_v48  ;;  %v490_v22 = vand.u32 2147483647, %v1207_v48 }
 0x42a   :  { %895 = vrcp.f32 %v1202_v46  ;;  %v519_v35 = vsel %vm1293_vm4, %v1210_v49, %v515_v21 }
 0x42b   :  { %897 = vrcp.f32 %v1200_v45  ;;  %v493_v34 = vor.u32 1.1754944e-38, %v492_v18  ;;  %vm491_vm6 = vcmp.eq.f32.partialorder %v490_v22, 8.507059e+37 }
 0x42e   :  { %v1230_v59 = vpop.xlane.xlu2 %390 }
 0x42f   :  { %v1218_v52 = vpop.eup %893 }
 0x430   :  { %v1220_v53 = vpop.eup %895  ;;  %v482_v54 = vmul.f32 %v1218_v52, %v1207_v48  ;;  %v1224_v55 = vpop.f32.mrf.mxu3  ;;  %vm487_vm12 = vweird.f32 %v1218_v52 }
 0x431   :  { %v1226_v56 = vpop.xlane.xlu0 %387  ;;  %v1228_v57 = vpop.eup %897  ;;  %v527_v63 = vmul.f32 %v1220_v53, %v1202_v46  ;;  %vm1275_vm1 = vmor %vm486_vm15, %vm487_vm12  ;;  %vm532_vm10 = vweird.f32 %v1220_v53  ;;  %vm1316_vm12 = vcmp.eq.f32.partialorder %v535_v30, 8.507059e+37 }
 0x432   :  { %899 = vrcp.f32 %v1226_v56  ;;  %v483_v61 = vsub.f32 1.0, %v482_v54  ;;  %v497_v4 = vmul.f32 %v1228_v57, %v1200_v45  ;;  %vm502_vm13 = vweird.f32 %v1228_v57  ;;  %v457_v60 = vpop.f32.mrf.mxu1  ;;  %vm1329_vm15 = vmor %vm546_vm14, %vm547_vm2 }
 0x433   :  { %901 = vrcp.f32 %v1230_v59  ;;  %v528_v12 = vsub.f32 1.0, %v527_v63  ;;  %v524_v54 = vsel %vm1251_vm11, %v523_v14, %v519_v35  ;;  %v549_v7 = vsel %vm1329_vm15, %v1216_v51, %v545_v42  ;;  %vm1349_vm14 = vmor %vm501_vm3, %vm502_vm13 }
 0x434   :  { %v484_v5 = vmul.f32 %v1218_v52, %v483_v61  ;;  %v498_v16 = vsub.f32 1.0, %v497_v4  ;;  %v582_v8 = vand.u32 2147483648, %v1226_v56  ;;  %v603_v46 = vmul.f32 %v524_v54, %v1205_v47 }
 0x435   :  { %v529_v29 = vmul.f32 %v1220_v53, %v528_v12  ;;  %vm576_vm2 = vweird.f32 %v1226_v56  ;;  %v580_v51 = vand.u32 2147483647, %v1226_v56  ;;  %v711_v12 = vld [vmem:[%s1466_s4 + $0x28] sm:$0xff] }
 0x436   :  { %v485_v15 = vadd.f32 %v1218_v52, %v484_v5  ;;  %v499_v32 = vmul.f32 %v1228_v57, %v498_v16  ;;  %v583_v21 = vor.u32 1.1754944e-38, %v582_v8  ;;  %v712_v8 = vld [vmem:[%s1466_s4 + $0x30] sm:$0xff] }
 0x437   :  { %v530_v49 = vadd.f32 %v1220_v53, %v529_v29 }
 0x438   :  { %v1249_v11 = vpop.eup %899  ;;  %v1261_v19 = vpop.f32.mrf.mxu3  ;;  %v489_v31 = vsel %vm1275_vm1, %v1218_v52, %v485_v15  ;;  %v500_v58 = vadd.f32 %v1228_v57, %v499_v32  ;;  %vm1337_vm1 = vmor %vm531_vm5, %vm532_vm10  ;;  %vm581_vm10 = vcmp.eq.f32.partialorder %v580_v51, 8.507059e+37  ;;  %v710_v51 = vld [vmem:[%s1466_s4 + $0x20] sm:$0xff] }
 0x439   :  { %v572_v17 = vmul.f32 %v1249_v11, %v1226_v56  ;;  %v1264_v20 = vpop.xlane.xlu0 %384  ;;  %v1270_v23 = vpop.eup %901  ;;  %v494_v41 = vsel %vm491_vm6, %v493_v34, %v489_v31  ;;  %vm577_vm11 = vweird.f32 %v1249_v11  ;;  %v534_v13 = vsel %vm1337_vm1, %v1220_v53, %v530_v49 }
 0x43a   :  { %903 = vrcp.f32 %v1264_v20  ;;  %v587_v36 = vmul.f32 %v1270_v23, %v1230_v59  ;;  %v601_v1 = vmul.f32 %v494_v41, %v457_v60  ;;  %v504_v14 = vsel %vm1349_vm14, %v1228_v57, %v500_v58  ;;  %vm1365_vm3 = vmor %vm576_vm2, %vm577_vm11 }
 0x43b   :  { %v573_v25 = vsub.f32 1.0, %v572_v17  ;;  %v567_v45 = vand.u32 2147483648, %v1264_v20  ;;  %v565_v53 = vand.u32 2147483647, %v1264_v20  ;;  %v554_v57 = vsel %vm1303_vm7, %v1247_v9, %v549_v7 }
 0x43c   :  { %v588_v63 = vsub.f32 1.0, %v587_v36  ;;  %v609_v16 = vadd.f32 %v603_v46, %v601_v1  ;;  %vm561_vm5 = vweird.f32 %v1264_v20  ;;  %v509_v22 = vsel %vm1310_vm8, %v508_v39, %v504_v14  ;;  %v669_v1 = vld [vmem:[%s1465_s3 + $0x10] sm:$0xff] }
 0x43d   :  { %v574_v38 = vmul.f32 %v1249_v11, %v573_v25  ;;  %v539_v24 = vsel %vm1316_vm12, %v538_v6, %v534_v13  ;;  %v605_v25 = vmul.f32 %v554_v57, %v1261_v19  ;;  %v568_v26 = vor.u32 1.1754944e-38, %v567_v45  ;;  %v709_v45 = vld [vmem:[%s1466_s4 + $0x18] sm:$0xff] }
 0x43e   :  { %v589_v17 = vmul.f32 %v1270_v23, %v588_v63  ;;  %vm592_vm7 = vweird.f32 %v1270_v23  ;;  %vm566_vm13 = vcmp.eq.f32.partialorder %v565_v53, 8.507059e+37  ;;  %vm591_vm8 = vweird.f32 %v1230_v59  ;;  %v670_v63 = vld [vmem:[%s1465_s3 + $0x18] sm:$0xff] }
 0x43f   :  { %v575_v4 = vadd.f32 %v1249_v11, %v574_v38  ;;  %v611_v9 = vadd.f32 %v609_v16, %v605_v25  ;;  %v597_v31 = vand.u32 2147483648, %v1230_v59  ;;  %v602_v19 = vmul.f32 %v509_v22, %v1197_v44  ;;  %vm593_vm12 = vmor %vm591_vm8, %vm592_vm7  ;;  %693 = vmatpush.msra.mxu1 %v670_v63  ;;  %v708_v16 = vld [vmem:[%s1466_s4 + $0x10] sm:$0xff] }
 0x440   :  { %v904_v48 = vpop.eup %903  ;;  %v472_v62 = vpop.f32.mrf.mxu3  ;;  %v590_v29 = vadd.f32 %v1270_v23, %v589_v17  ;;  %v604_v32 = vmul.f32 %v539_v24, %v1224_v55  ;;  %v595_v34 = vand.u32 2147483647, %v1230_v59 }
 0x441   :  { %v557_v61 = vmul.f32 %v904_v48, %v1264_v20  ;;  %vm562_vm4 = vweird.f32 %v904_v48  ;;  %v579_v56 = vsel %vm1365_vm3, %v1249_v11, %v575_v4  ;;  %v598_v38 = vor.u32 1.1754944e-38, %v597_v31  ;;  %694 = vmatpush.msra.mxu1 %v669_v1  ;;  %v667_v4 = vld [vmem:[%s1465_s3] sm:$0xff] }
 0x442   :  { %vm563_vm6 = vmor %vm561_vm5, %vm562_vm4  ;;  %v584_v28 = vsel %vm581_vm10, %v583_v21, %v579_v56  ;;  %v594_v37 = vsel %vm593_vm12, %v1270_v23, %v590_v29  ;;  %v610_v39 = vadd.f32 %v604_v32, %v602_v19  ;;  %vm596_vm15 = vcmp.eq.f32.partialorder %v595_v34, 8.507059e+37  ;;  %v863_v21 = vld [vmem:[#allocation7 + $0x2] ss:$0 sm:$0xff]  ;;  %v707_v32 = vld [vmem:[%s1466_s4 + $0x8] sm:$0xff] }
 0x443   :  { %v558_v43 = vsub.f32 1.0, %v557_v61  ;;  %v599_v44 = vsel %vm596_vm15, %v598_v38, %v594_v37  ;;  %695 = vmatpush.msra.mxu1 %v668_v3  ;;  %v865_v34 = vld [vmem:[%s1467_s5] ss:$0 sm:$0xff] }
 0x445   :  { %v559_v15 = vmul.f32 %v904_v48, %v558_v43  ;;  %696 = vmatpush.msra.mxu1 %v667_v4  ;;  %v713_v43 = vld [vmem:[%s1466_s4 + $0x38] sm:$0xff] }
 0x447   :  { %v560_v18 = vadd.f32 %v904_v48, %v559_v15  ;;  %729 = vmatpush.msrb.mxu1 %v713_v43 }
 0x448   :  { %v475_v27 = vpop.f32.mrf.mxu3 }
 0x449   :  { %v564_v11 = vsel %vm563_vm6, %v904_v48, %v560_v18  ;;  %v607_v20 = vmul.f32 %v584_v28, %v475_v27  ;;  %730 = vmatpush.msrb.mxu1 %v712_v8 }
 0x44a   :  { %v569_v30 = vsel %vm566_vm13, %v568_v26, %v564_v11  ;;  %v864_v11 = vld [vmem:[#allocation7 + $0x3] ss:$0 sm:$0xff] }
 0x44b   :  { %v613_v33 = vadd.f32 %v611_v9, %v607_v20  ;;  %v606_v35 = vmul.f32 %v569_v30, %v472_v62  ;;  %731 = vmatpush.msrb.mxu1 %v711_v12 }
 0x44d   :  { %v1391_v36 = vadd.f32 %v613_v33, %v1078_v0  ;;  %v612_v55 = vadd.f32 %v610_v39, %v606_v35  ;;  %732 = vmatpush.msrb.mxu1 %v710_v51  ;;  %v706_v33 = vld [vmem:[%s1466_s4] sm:$0xff]  ;;  %s1025_s4 = smov [#allocation8]  }
 0x44e   :  { %s752_s5 = sshll.u32 %s1025_s4, 4  ;;  %s753_s5 = int_to_ptr.vmem [resolvable:$true] %s752_s5 }
 0x44f   :  { %v617_v40 = vsel %vm87_vm0, %v1391_v36, 0.0  ;;  %733 = vmatpush.msrb.mxu1 %v709_v45 }
 0x450   :  { %v478_v41 = vpop.f32.mrf.mxu3  ;;  %618 = vadd.xlane.f32.xlu1 %v617_v40 }
 0x451   :  { %v608_v42 = vmul.f32 %v599_v44, %v478_v41  ;;  %734 = vmatpush.msrb.mxu1 %v708_v16  ;;  %v866_v44 = vld [vmem:[#allocation7 + $0x4] ss:$0 sm:$0xff] }
 0x453   :  { %v614_v48 = vadd.f32 %v612_v55, %v608_v42  ;;  %735 = vmatpush.msrb.mxu1 %v707_v32 }
 0x455   :  { %v1397_v59 = vadd.f32 %v614_v48, %v1082_v2  ;;  %736 = vmatpush.msrb.mxu1 %v706_v33 }
 0x457   :  { %v620_v0 = vsel %vm87_vm0, %v1397_v59, 0.0 }
 0x458   :  { %621 = vadd.xlane.f32.xlu0 %v620_v0 }
 0x4c3   :  { %v619_v23 = vpop.xlane.xlu1 %618 }
 0x4c4   :  { %v623_v50 = vmul.f32 %v619_v23, %v1086_v10 }
 0x4c6   :  { %v625_v49 = vsub.f32 %v1391_v36, %v623_v50 }
 0x4c8   :  { %v627_v52 = vmul.f32 %v625_v49, %v625_v49 }
 0x4ca   :  { %v629_v54 = vsel %vm87_vm0, %v627_v52, 0.0 }
 0x4cb   :  { %v622_v58 = vpop.xlane.xlu0 %621  ;;  %630 = vadd.xlane.f32.xlu2 %v629_v54 }
 0x4cc   :  { %v624_v60 = vmul.f32 %v622_v58, %v1086_v10 }
 0x4ce   :  { %v626_v61 = vsub.f32 %v1397_v59, %v624_v60 }
 0x4d0   :  { %v628_v2 = vmul.f32 %v626_v61, %v626_v61 }
 0x4d2   :  { %v632_v62 = vsel %vm87_vm0, %v628_v2, 0.0 }
 0x4d3   :  { %633 = vadd.xlane.f32.xlu1 %v632_v62 }
 0x53e   :  { %v631_v5 = vpop.xlane.xlu2 %630 }
 0x53f   :  { %v635_v6 = vmul.f32 %v631_v5, %v1086_v10 }
 0x541   :  { %v637_v7 = vadd.f32 1e-06, %v635_v6 }
 0x543   :  { %905 = vrsqrt.f32 %v637_v7  ;;  %vm645_vm1 = vweird.f32 %v637_v7 }
 0x546   :  { %v634_v46 = vpop.xlane.xlu1 %633 }
 0x547   :  { %v636_v13 = vmul.f32 %v634_v46, %v1086_v10 }
 0x549   :  { %v906_v14 = vpop.eup %905  ;;  %v638_v15 = vadd.f32 1e-06, %v636_v13 }
 0x54a   :  { %v640_v47 = vmul.f32 %v906_v14, %v637_v7  ;;  %vm646_vm11 = vweird.f32 %v906_v14 }
 0x54b   :  { %907 = vrsqrt.f32 %v638_v15  ;;  %vm647_vm14 = vmor %vm645_vm1, %vm646_vm11  ;;  %vm655_vm4 = vweird.f32 %v638_v15 }
 0x54c   :  { %v641_v53 = vmul.f32 %v906_v14, %v640_v47 }
 0x54e   :  { %v642_v10 = vmul.f32 0.5, %v641_v53 }
 0x550   :  { %v643_v56 = vsub.f32 1.5, %v642_v10 }
 0x551   :  { %v908_v17 = vpop.eup %907 }
 0x552   :  { %v644_v57 = vmul.f32 %v906_v14, %v643_v56  ;;  %v650_v18 = vmul.f32 %v908_v17, %v638_v15  ;;  %vm656_vm2 = vweird.f32 %v908_v17 }
 0x553   :  { %vm657_vm3 = vmor %vm655_vm4, %vm656_vm2 }
 0x554   :  { %v648_v22 = vsel %vm647_vm14, %v906_v14, %v644_v57  ;;  %v651_v24 = vmul.f32 %v908_v17, %v650_v18 }
 0x555   :  { %v659_v25 = vmul.f32 %v648_v22, %v625_v49 }
 0x556   :  { %v652_v26 = vmul.f32 0.5, %v651_v24 }
 0x557   :  { %v662_v27 = vmul.f32 %v863_v21, %v659_v25 }
 0x558   :  { %v653_v28 = vsub.f32 1.5, %v652_v26 }
 0x559   :  { %v665_v9 = vadd.f32 %v864_v11, %v662_v27 }
 0x55a   :  { %v654_v20 = vmul.f32 %v908_v17, %v653_v28 }
 0x55b   :  { %796 = vmatmul.msk.f32.vlgmr.msra.gmra.mxu1 %vm87_vm0, %v665_v9 }
 0x55c   :  { %v658_v29 = vsel %vm657_vm3, %v908_v17, %v654_v20 }
 0x55d   :  { %v660_v30 = vmul.f32 %v658_v29, %v626_v61 }
 0x55f   :  { %v663_v31 = vmul.f32 %v863_v21, %v660_v30 }
 0x561   :  { %v666_v19 = vadd.f32 %v864_v11, %v663_v31 }
 0x563   :  { %797 = vmatmul.msk.f32.gmra.mxu1 %vm87_vm0, %v666_v19 }
 0x5d8   :  { %v698_v35 = vpop.f32.mrf.mxu1 }
 0x5d9   :  { %v699_v37 = vadd.f32 %v865_v34, %v698_v35 }
 0x5db   :  { %v704_v38 = vmax.f32 %v699_v37, 0.0 }
 0x5dd   :  { %798 = vmatmul.msk.f32.vlgmr.msrb.gmra.mxu1 %vm319_vm9, %v704_v38 }
 0x5e0   :  { %v701_v39 = vpop.f32.mrf.mxu1 }
 0x5e1   :  { %v702_v40 = vadd.f32 %v865_v34, %v701_v39 }
 0x5e3   :  { %v705_v41 = vmax.f32 %v702_v40, 0.0 }
 0x5e5   :  { %799 = vmatmul.msk.f32.gmra.mxu1 %vm319_vm9, %v705_v41 }
 0x65a   :  { %v738_v55 = vpop.f32.mrf.mxu1 }
 0x65b   :  { %v739_v42 = vadd.f32 %v866_v44, %v738_v55 }
 0x65d   :  { %v744_v48 = vadd.f32 %v739_v42, %v1391_v36 }
 0x65f   :  { %746 = vst.msk [vmem:[#allocation8] sm:$0xff] %vm87_vm0, %v744_v48 }
 0x662   :  { %v741_v0 = vpop.f32.mrf.mxu1 }
 0x663   :  { %v742_v23 = vadd.f32 %v866_v44, %v741_v0 }
 0x665   :  { %v745_v50 = vadd.f32 %v742_v23, %v1397_v59 }
 0x667   :  { %747 = vst.msk [vmem:[#allocation8 + $0x8] sm:$0xff] %vm87_vm0, %v745_v50 }
 0x668   :  { %760 = dma.vmem_to_hbm [thread:$0]  %s753_s5, 256, %s755_s0, [#allocation4], %s1015_s13, %s1015_s13, %s1016_s14  }
 0x669   :  { %1009 = dma.done.wait [#allocation4], 256  }
 0x66a   :  { %1010 = vsyncadd [#allocation4], 4294967040 }
 0x66b   :  { %765 = vsyncpa [#allocation3], 1 }
 0x66c   :  { %766 = vsyncpa [#allocation6], 1 }
 0x66d   :  { %767 = vsyncpa [#allocation4], 1 }

</bundles_post_ra>
